<compile_context>
chip_gen: v5e
topology: v5e:2x2
jax: 0.10.0
libtpu: 0.0.40
codegen_flags: <defaults>
</compile_context>

<pallas_src>
import math

import jax
import jax.numpy as jnp
from jax import lax
from jax.experimental import pallas as pl
from jax.experimental.pallas import tpu as pltpu


LANE_CHUNK = 512      # in-kernel sub-tile: (8, 512) f32 = 4 vregs per activation
MAX_TILE_B = 65536    # max lanes per grid step: 8 * 65536 * 4B = 2 MiB input tile


def _round_up(a, m):
    return ((a + m - 1) // m) * m


def _pad_to(a, shape):
    return jnp.pad(a, [(0, s - d) for s, d in zip(shape, a.shape)])


def _make_kernel(n_chunks, chunk):
    def kernel(x_ref,
               w1_ref, b1_ref, w2_ref, b2_ref, w3_ref, b3_ref, w4_ref, b4_ref,
               o_ref):
        # Hoist the tiny (8, K) weights / (8, 1) biases out of the lane-chunk loop:
        # one VMEM load per grid step, reused by every chunk (JAX does not CSE these).
        w1, b1 = w1_ref[...], b1_ref[...]
        w2, b2 = w2_ref[...], b2_ref[...]
        w3, b3 = w3_ref[...], b3_ref[...]
        w4, b4 = w4_ref[...], b4_ref[...]
        n_out = o_ref.shape[0]

        def chunk_body(c, carry):
            off = pl.multiple_of(c * chunk, chunk)
            h = x_ref[:, pl.ds(off, chunk)]                       # (F, chunk), batch on lanes
            # Contractions on the MXU (f32 accumulate); bias + ReLU on the VPU.
            h = jnp.maximum(jnp.dot(w1, h, preferred_element_type=jnp.float32) + b1, 0.0)
            h = jnp.maximum(jnp.dot(w2, h, preferred_element_type=jnp.float32) + b2, 0.0)
            h = jnp.maximum(jnp.dot(w3, h, preferred_element_type=jnp.float32) + b3, 0.0)
            z = jnp.dot(w4, h, preferred_element_type=jnp.float32) + b4
            # Sigmoid epilogue on the EUP slot: exp + approximate reciprocal.
            s = pl.reciprocal(1.0 + jnp.exp(-z), approx=True)
            o_ref[:, pl.ds(off, chunk)] = s[:n_out, :]            # lane-dense store
            return carry

        lax.fori_loop(0, n_chunks, chunk_body, None,
                      unroll=2 if (n_chunks % 2 == 0 and n_chunks > 1) else 1)

    return kernel


def mlp_forward(x, params):
    """x: (B, input_features).  params: PyTorch-layout w_i (out, in), b_i (out,)."""
    x = x.astype(jnp.float32)
    B, F = x.shape
    out_f = params["w4"].shape[0]
    assert out_f <= 8, "output padding scheme assumes <= 8 output features"

    # Zero-pad every layer to 8 output rows (one sublane group).  Padded rows stay
    # exactly 0 through bias + ReLU, so the zero-padded downstream weight columns
    # never contribute; the final padded rows are sliced off in the kernel.
    w1 = _pad_to(params["w1"].astype(jnp.float32), (8, F))
    w2 = _pad_to(params["w2"].astype(jnp.float32), (8, 8))
    w3 = _pad_to(params["w3"].astype(jnp.float32), (8, 8))
    w4 = _pad_to(params["w4"].astype(jnp.float32), (8, 8))
    b1 = _pad_to(params["b1"].astype(jnp.float32).reshape(-1, 1), (8, 1))
    b2 = _pad_to(params["b2"].astype(jnp.float32).reshape(-1, 1), (8, 1))
    b3 = _pad_to(params["b3"].astype(jnp.float32).reshape(-1, 1), (8, 1))
    b4 = _pad_to(params["b4"].astype(jnp.float32).reshape(-1, 1), (8, 1))

    # Batch tile: large enough to amortize the ~0.35 us per-grid-step overhead (up to a
    # 2 MiB input block), small enough to keep ~8 grid steps for megacore sharding.
    tile_b = min(MAX_TILE_B, max(LANE_CHUNK, _round_up(pl.cdiv(B, 8), LANE_CHUNK)))
    b_pad = _round_up(B, tile_b)
    grid_b = b_pad // tile_b
    n_chunks = tile_b // LANE_CHUNK

    # Feature-major layout (batch on lanes).  transpose + pad fuse into one relayout
    # pass under jit; no 3-D reshape.
    x_t = jnp.pad(x.T, ((0, 0), (0, b_pad - B)))                  # (F, b_pad)

    def const_spec(shape):
        return pl.BlockSpec(shape, lambda i: (0, 0))

    out2 = pl.pallas_call(
        _make_kernel(n_chunks, LANE_CHUNK),
        out_shape=jax.ShapeDtypeStruct((out_f, b_pad), jnp.float32),
        grid=(grid_b,),
        in_specs=[
            # TODO(synk): on v5e, sweep pipeline_mode=pl.Buffered(3) on this x spec once
            # the kernel is DMA-bound (few-% gain per review).
            pl.BlockSpec((F, tile_b), lambda i: (0, i)),
            const_spec((8, F)), const_spec((8, 1)),
            const_spec((8, 8)), const_spec((8, 1)),
            const_spec((8, 8)), const_spec((8, 1)),
            const_spec((8, 8)), const_spec((8, 1)),
        ],
        out_specs=pl.BlockSpec((out_f, tile_b), lambda i: (0, i)),
        compiler_params=pltpu.CompilerParams(dimension_semantics=("parallel",)),
    )(x_t, w1, b1, w2, b2, w3, b3, w4, b4)

    # (out_f, b_pad) -> (B, out_f)
    return out2.T[:B]


def init_params(key, input_features, output_features):
    """Deterministic init mimicking nn.Linear's U(-1/sqrt(in), 1/sqrt(in)); PyTorch (out,in) layout."""
    dims = [(7, input_features), (5, 7), (3, 5), (output_features, 3)]
    params = {}
    for i, (fan_out, fan_in) in enumerate(dims, start=1):
        key, kw, kb = jax.random.split(key, 3)
        bound = 1.0 / math.sqrt(fan_in)
        params[f"w{i}"] = jax.random.uniform(
            kw, (fan_out, fan_in), jnp.float32, minval=-bound, maxval=bound)
        params[f"b{i}"] = jax.random.uniform(
            kb, (fan_out,), jnp.float32, minval=-bound, maxval=bound)
    return params


def reference_forward(x, params):
    hp = jax.lax.Precision.HIGHEST
    h = jnp.maximum(jnp.dot(x, params["w1"].T, precision=hp) + params["b1"], 0.0)
    h = jnp.maximum(jnp.dot(h, params["w2"].T, precision=hp) + params["b2"], 0.0)
    h = jnp.maximum(jnp.dot(h, params["w3"].T, precision=hp) + params["b3"], 0.0)
    return jax.nn.sigmoid(jnp.dot(h, params["w4"].T, precision=hp) + params["b4"])


if __name__ == "__main__":
    key = jax.random.PRNGKey(0)
    input_features = 8      # diabetes dataset has 8 features
    output_features = 1     # binary outcome

    key, kp = jax.random.split(key)
    params = init_params(kp, input_features, output_features)

    fwd = jax.jit(mlp_forward)

    # Tolerance is relaxed vs. the pure-VPU version: the MXU f32 multi-pass lowering and
    # the approx reciprocal in the sigmoid epilogue differ slightly from the HIGHEST-
    # precision f32 reference (sanctioned by the performance review).
    ATOL = 2e-3
    RTOL = 2e-3

    # Small batch: single grid step, single lane chunk, heavy padding path.
    key, kx = jax.random.split(key)
    x_small = jax.random.normal(kx, (16, input_features), dtype=jnp.float32)
    out_small = jax.block_until_ready(fwd(x_small, params))
    ref_small = reference_forward(x_small, params)
    assert out_small.shape == (16, output_features)
    assert jnp.allclose(out_small, ref_small, atol=ATOL, rtol=RTOL), "mismatch (small batch)"

    # Larger batch: multi-step grid + multi-chunk inner loop + batch padding.
    key, kx2 = jax.random.split(key)
    x_big = jax.random.normal(kx2, (4100, input_features), dtype=jnp.float32)
    out_big = jax.block_until_ready(fwd(x_big, params))
    ref_big = reference_forward(x_big, params)
    assert out_big.shape == (4100, output_features)
    assert jnp.allclose(out_big, ref_big, atol=ATOL, rtol=RTOL), "mismatch (large batch)"

    print("KERNEL_OK")
</pallas_src>

<mosaic_0001>
module attributes {stable_mosaic.version = 11 : i64} {
  func.func @kernel(%arg0: i32, %arg1: memref<8x512xf32, #tpu.memory_space<vmem>>, %arg2: memref<8x8xf32, #tpu.memory_space<vmem>>, %arg3: memref<8x1xf32, #tpu.memory_space<vmem>>, %arg4: memref<8x8xf32, #tpu.memory_space<vmem>>, %arg5: memref<8x1xf32, #tpu.memory_space<vmem>>, %arg6: memref<8x8xf32, #tpu.memory_space<vmem>>, %arg7: memref<8x1xf32, #tpu.memory_space<vmem>>, %arg8: memref<8x8xf32, #tpu.memory_space<vmem>>, %arg9: memref<8x1xf32, #tpu.memory_space<vmem>>, %arg10: memref<1x512xf32, #tpu.memory_space<vmem>>) attributes {dimension_semantics = [#tpu.dimension_semantics<parallel>], iteration_bounds = array<i64: 1>, scalar_prefetch = 0 : i64, scratch_operands = 0 : i64, tpu.core_type = #tpu.core_type<tc>, window_params = [{transform_indices = @transform_0, window_bounds = array<i64: 8, 512>}, {pipeline_mode = #tpu.pipeline_mode<synchronous>, transform_indices = @transform_1, window_bounds = array<i64: 8, 8>}, {pipeline_mode = #tpu.pipeline_mode<synchronous>, transform_indices = @transform_2, window_bounds = array<i64: 8, 1>}, {pipeline_mode = #tpu.pipeline_mode<synchronous>, transform_indices = @transform_3, window_bounds = array<i64: 8, 8>}, {pipeline_mode = #tpu.pipeline_mode<synchronous>, transform_indices = @transform_4, window_bounds = array<i64: 8, 1>}, {pipeline_mode = #tpu.pipeline_mode<synchronous>, transform_indices = @transform_5, window_bounds = array<i64: 8, 8>}, {pipeline_mode = #tpu.pipeline_mode<synchronous>, transform_indices = @transform_6, window_bounds = array<i64: 8, 1>}, {pipeline_mode = #tpu.pipeline_mode<synchronous>, transform_indices = @transform_7, window_bounds = array<i64: 8, 8>}, {pipeline_mode = #tpu.pipeline_mode<synchronous>, transform_indices = @transform_8, window_bounds = array<i64: 8, 1>}, {transform_indices = @transform_9, window_bounds = array<i64: 1, 512>}]} {
    %c0 = arith.constant 0 : index
    %c0_0 = arith.constant 0 : index
    %0 = vector.load %arg2[%c0, %c0_0] : memref<8x8xf32, #tpu.memory_space<vmem>>, vector<8x8xf32>
    %c0_1 = arith.constant 0 : index
    %c0_2 = arith.constant 0 : index
    %1 = vector.load %arg3[%c0_1, %c0_2] : memref<8x1xf32, #tpu.memory_space<vmem>>, vector<8x1xf32>
    %c0_3 = arith.constant 0 : index
    %c0_4 = arith.constant 0 : index
    %2 = vector.load %arg4[%c0_3, %c0_4] : memref<8x8xf32, #tpu.memory_space<vmem>>, vector<8x8xf32>
    %c0_5 = arith.constant 0 : index
    %c0_6 = arith.constant 0 : index
    %3 = vector.load %arg5[%c0_5, %c0_6] : memref<8x1xf32, #tpu.memory_space<vmem>>, vector<8x1xf32>
    %c0_7 = arith.constant 0 : index
    %c0_8 = arith.constant 0 : index
    %4 = vector.load %arg6[%c0_7, %c0_8] : memref<8x8xf32, #tpu.memory_space<vmem>>, vector<8x8xf32>
    %c0_9 = arith.constant 0 : index
    %c0_10 = arith.constant 0 : index
    %5 = vector.load %arg7[%c0_9, %c0_10] : memref<8x1xf32, #tpu.memory_space<vmem>>, vector<8x1xf32>
    %c0_11 = arith.constant 0 : index
    %c0_12 = arith.constant 0 : index
    %6 = vector.load %arg8[%c0_11, %c0_12] : memref<8x8xf32, #tpu.memory_space<vmem>>, vector<8x8xf32>
    %c0_13 = arith.constant 0 : index
    %c0_14 = arith.constant 0 : index
    %7 = vector.load %arg9[%c0_13, %c0_14] : memref<8x1xf32, #tpu.memory_space<vmem>>, vector<8x1xf32>
    %c0_i32 = arith.constant 0 : i32
    %c512_i32 = arith.constant 512 : i32
    %8 = arith.muli %c0_i32, %c512_i32 : i32
    %9 = tpu.assume_multiple %8, 512 : i32
    %c0_15 = arith.constant 0 : index
    %10 = arith.index_cast %9 : i32 to index
    %11 = vector.load %arg1[%c0_15, %10] : memref<8x512xf32, #tpu.memory_space<vmem>>, vector<8x512xf32>
    %cst = arith.constant dense<0.000000e+00> : vector<8x512xf32>
    %12 = tpu.matmul %0, %11, %cst {dimension_numbers = #tpu.dot_dimension_numbers<[1], [0], [0], [1], [0, 0, 1, 1], [], []>} : vector<8x8xf32>, vector<8x512xf32>, vector<8x512xf32> -> vector<8x512xf32>
    %13 = vector.broadcast %1 : vector<8x1xf32> to vector<8x512xf32>
    %14 = arith.addf %12, %13 : vector<8x512xf32>
    %cst_16 = arith.constant 0.000000e+00 : f32
    %15 = vector.broadcast %cst_16 : f32 to vector<8x512xf32>
    %16 = arith.maximumf %14, %15 : vector<8x512xf32>
    %cst_17 = arith.constant dense<0.000000e+00> : vector<8x512xf32>
    %17 = tpu.matmul %2, %16, %cst_17 {dimension_numbers = #tpu.dot_dimension_numbers<[1], [0], [0], [1], [0, 0, 1, 1], [], []>} : vector<8x8xf32>, vector<8x512xf32>, vector<8x512xf32> -> vector<8x512xf32>
    %18 = vector.broadcast %3 : vector<8x1xf32> to vector<8x512xf32>
    %19 = arith.addf %17, %18 : vector<8x512xf32>
    %cst_18 = arith.constant 0.000000e+00 : f32
    %20 = vector.broadcast %cst_18 : f32 to vector<8x512xf32>
    %21 = arith.maximumf %19, %20 : vector<8x512xf32>
    %cst_19 = arith.constant dense<0.000000e+00> : vector<8x512xf32>
    %22 = tpu.matmul %4, %21, %cst_19 {dimension_numbers = #tpu.dot_dimension_numbers<[1], [0], [0], [1], [0, 0, 1, 1], [], []>} : vector<8x8xf32>, vector<8x512xf32>, vector<8x512xf32> -> vector<8x512xf32>
    %23 = vector.broadcast %5 : vector<8x1xf32> to vector<8x512xf32>
    %24 = arith.addf %22, %23 : vector<8x512xf32>
    %cst_20 = arith.constant 0.000000e+00 : f32
    %25 = vector.broadcast %cst_20 : f32 to vector<8x512xf32>
    %26 = arith.maximumf %24, %25 : vector<8x512xf32>
    %cst_21 = arith.constant dense<0.000000e+00> : vector<8x512xf32>
    %27 = tpu.matmul %6, %26, %cst_21 {dimension_numbers = #tpu.dot_dimension_numbers<[1], [0], [0], [1], [0, 0, 1, 1], [], []>} : vector<8x8xf32>, vector<8x512xf32>, vector<8x512xf32> -> vector<8x512xf32>
    %28 = vector.broadcast %7 : vector<8x1xf32> to vector<8x512xf32>
    %29 = arith.addf %27, %28 : vector<8x512xf32>
    %cst_22 = arith.constant 0.000000e+00 : f32
    %30 = vector.broadcast %cst_22 : f32 to vector<8x512xf32>
    %31 = arith.subf %30, %29 : vector<8x512xf32>
    %32 = math.exp %31 : vector<8x512xf32>
    %cst_23 = arith.constant 1.000000e+00 : f32
    %33 = vector.broadcast %cst_23 : f32 to vector<8x512xf32>
    %34 = arith.addf %33, %32 : vector<8x512xf32>
    %35 = tpu.reciprocal %34 {approx = true} : vector<8x512xf32> -> vector<8x512xf32>
    %36 = vector.extract_strided_slice %35 {offsets = [0, 0], sizes = [1, 512], strides = [1, 1]} : vector<8x512xf32> to vector<1x512xf32>
    %c0_24 = arith.constant 0 : index
    %37 = arith.index_cast %9 : i32 to index
    %38 = vector.load %arg10[%c0_24, %37] : memref<1x512xf32, #tpu.memory_space<vmem>>, vector<1x512xf32>
    tpu.vector_store %arg10[%c0_24, %37], %36 {strides = array<i32>} : memref<1x512xf32, #tpu.memory_space<vmem>>, vector<1x512xf32>,
    %c1_i32 = arith.constant 1 : i32
    return
  }
  func.func @transform_0(%arg0: i32) -> (i32, i32) {
    %c0_i32 = arith.constant 0 : i32
    %c0_i32_0 = arith.constant 0 : i32
    return %c0_i32, %arg0 : i32, i32
  }
  func.func @transform_1(%arg0: i32) -> (i32, i32) {
    %c0_i32 = arith.constant 0 : i32
    %c0_i32_0 = arith.constant 0 : i32
    %c0_i32_1 = arith.constant 0 : i32
    return %c0_i32, %c0_i32_0 : i32, i32
  }
  func.func @transform_2(%arg0: i32) -> (i32, i32) {
    %c0_i32 = arith.constant 0 : i32
    %c0_i32_0 = arith.constant 0 : i32
    %c0_i32_1 = arith.constant 0 : i32
    return %c0_i32, %c0_i32_0 : i32, i32
  }
  func.func @transform_3(%arg0: i32) -> (i32, i32) {
    %c0_i32 = arith.constant 0 : i32
    %c0_i32_0 = arith.constant 0 : i32
    %c0_i32_1 = arith.constant 0 : i32
    return %c0_i32, %c0_i32_0 : i32, i32
  }
  func.func @transform_4(%arg0: i32) -> (i32, i32) {
    %c0_i32 = arith.constant 0 : i32
    %c0_i32_0 = arith.constant 0 : i32
    %c0_i32_1 = arith.constant 0 : i32
    return %c0_i32, %c0_i32_0 : i32, i32
  }
  func.func @transform_5(%arg0: i32) -> (i32, i32) {
    %c0_i32 = arith.constant 0 : i32
    %c0_i32_0 = arith.constant 0 : i32
    %c0_i32_1 = arith.constant 0 : i32
    return %c0_i32, %c0_i32_0 : i32, i32
  }
  func.func @transform_6(%arg0: i32) -> (i32, i32) {
    %c0_i32 = arith.constant 0 : i32
    %c0_i32_0 = arith.constant 0 : i32
    %c0_i32_1 = arith.constant 0 : i32
    return %c0_i32, %c0_i32_0 : i32, i32
  }
  func.func @transform_7(%arg0: i32) -> (i32, i32) {
    %c0_i32 = arith.constant 0 : i32
    %c0_i32_0 = arith.constant 0 : i32
    %c0_i32_1 = arith.constant 0 : i32
    return %c0_i32, %c0_i32_0 : i32, i32
  }
  func.func @transform_8(%arg0: i32) -> (i32, i32) {
    %c0_i32 = arith.constant 0 : i32
    %c0_i32_0 = arith.constant 0 : i32
    %c0_i32_1 = arith.constant 0 : i32
    return %c0_i32, %c0_i32_0 : i32, i32
  }
  func.func @transform_9(%arg0: i32) -> (i32, i32) {
    %c0_i32 = arith.constant 0 : i32
    %c0_i32_0 = arith.constant 0 : i32
    return %c0_i32, %arg0 : i32, i32
  }
}

</mosaic_0001>

<bundles_post_ra>
// kernel: mlp_forward.1
= control target key start
LH: loop header
LB: loop body
LE: loop exit
PB: predicated region body
PF: predicated region fallthrough
CT: control target
= control target key end

     0   :  { %vm49_vm0 = vcmask 64512   ;;  %v487_v3 = vmov 0   ;;  %vm436_vm1 = vcmask 1040384   ;;  %vm438_vm2 = vcmask 1042434   ;;  %s593_s0 = inlined_call_operand.vmem [shape: f32[8,512], index: 0, kind: input, shape index: {}]   ;;  %s594_s1 = inlined_call_operand.vmem [shape: f32[8,8], index: 1, kind: input, shape index: {}]   ;;  %s595_s2 = inlined_call_operand.vmem [shape: f32[8,1], index: 2, kind: input, shape index: {}]   ;;  %s596_s4 = inlined_call_operand.vmem [shape: f32[8,1], index: 4, kind: input, shape index: {}]   ;;  %s597_s3 = inlined_call_operand.vmem [shape: f32[8,8], index: 3, kind: input, shape index: {}]   ;;  %s598_s6 = inlined_call_operand.vmem [shape: f32[8,1], index: 6, kind: input, shape index: {}]   ;;  %s599_s8 = inlined_call_operand.vmem [shape: f32[8,1], index: 8, kind: input, shape index: {}]   ;;  %s600_s5 = inlined_call_operand.vmem [shape: f32[8,8], index: 5, kind: input, shape index: {}]   ;;  %s601_s7 = inlined_call_operand.vmem [shape: f32[8,8], index: 7, kind: input, shape index: {}]   ;;  %s602_s9 = inlined_call_operand.vmem [shape: f32[1,512], index: 9, kind: output, shape index: {}]  }
   0x1   :  { %v40_v0 = vld [vmem:[%s593_s0] sm:$0xff]  ;;  %v41_v1 = vld [vmem:[%s593_s0 + $0x8] sm:$0xff]  ;;  %v42_v2 = vld [vmem:[%s593_s0 + $0x10] sm:$0xff]  ;;  %469 = vset.pattern.permute.xlu0 %v487_v3  ;;  %470 = vset.pattern.permute.xlu1 %v487_v3  ;;  %vm440_vm3 = vcmask 1041408  }
   0x2   :  { %68 = vmatpush.msra.mxu0 %v40_v0  ;;  %88 = vmatpush.msra.mxu1 %v41_v1  ;;  %v43_v4 = vld [vmem:[%s593_s0 + $0x18] sm:$0xff]  ;;  %v32_v5 = vld [vmem:[%s594_s1] sm:$0xff] }
   0x3   :  { %108 = vmatpush.msra.mxu2 %v42_v2  ;;  %128 = vmatpush.msra.mxu3 %v43_v4  ;;  %v33_v6 = vld [vmem:[%s595_s2] sm:$0xff] }
   0x4   :  { %452 = vmatmul.msk.f32.vlgmr.msra.gmra.mxu0 %vm49_vm0, %v32_v5  ;;  %453 = vmatmul.msk.f32.vlgmr.msra.gmra.mxu1 %vm49_vm0, %v32_v5  ;;  %v35_v7 = vld [vmem:[%s596_s4] sm:$0xff] }
   0x5   :  { %454 = vmatmul.msk.f32.vlgmr.msra.gmra.mxu2 %vm49_vm0, %v32_v5  ;;  %455 = vmatmul.msk.f32.vlgmr.msra.gmra.mxu3 %vm49_vm0, %v32_v5  ;;  %v34_v15 = vld [vmem:[%s597_s3] sm:$0xff] }
   0x6   :  { %46 = vperm.xlu0 %469, %v33_v6   ;;  %v37_v22 = vld [vmem:[%s598_s6] sm:$0xff] }
   0x7   :  { %231 = vperm.xlu1 %470, %v37_v22   ;;  %v39_v23 = vld [vmem:[%s599_s8] sm:$0xff] }
   0x8   :  { %v36_v31 = vld [vmem:[%s600_s5] sm:$0xff] }
   0x9   :  { %v38_v45 = vld [vmem:[%s601_s7] sm:$0xff] }
   0xe   :  { %139 = vperm.xlu0 %469, %v35_v7  }
   0xf   :  { %323 = vperm.xlu1 %470, %v39_v23  }
  0x78   :  { %v47_v8 = vpop.permute.xlu0 %46 }
  0x79   :  { %v232_v38 = vpop.permute.xlu1 %231 }
  0x80   :  { %v140_v24 = vpop.permute.xlu0 %139 }
  0x81   :  { %v70_v9 = vpop.f32.mrf.mxu0  ;;  %v90_v10 = vpop.f32.mrf.mxu1 }
  0x82   :  { %v71_v11 = vadd.f32 %v70_v9, %v47_v8  ;;  %v91_v12 = vadd.f32 %v90_v10, %v47_v8  ;;  %v324_v53 = vpop.permute.xlu1 %323 }
  0x84   :  { %v133_v13 = vmax.f32 %v71_v11, 0.0  ;;  %v134_v14 = vmax.f32 %v91_v12, 0.0 }
  0x86   :  { %160 = vmatpush.msrb.mxu0 %v133_v13  ;;  %180 = vmatpush.msrb.mxu1 %v134_v14  ;;  %v443_v14 = vlaneseq }
  0x87   :  { %456 = vmatmul.msk.f32.vlgmr.msrb.gmra.mxu0 %vm49_vm0, %v34_v15  ;;  %457 = vmatmul.msk.f32.vlgmr.msrb.gmra.mxu1 %vm49_vm0, %v34_v15 }
  0x88   :  { %v110_v16 = vpop.f32.mrf.mxu2  ;;  %v130_v17 = vpop.f32.mrf.mxu3  ;;  %vm445_vm4 = vcmp.lt.s32.totalorder %v443_v14, 512 }
  0x89   :  { %v111_v18 = vadd.f32 %v110_v16, %v47_v8  ;;  %v131_v19 = vadd.f32 %v130_v17, %v47_v8 }
  0x8b   :  { %v135_v20 = vmax.f32 %v111_v18, 0.0  ;;  %v136_v21 = vmax.f32 %v131_v19, 0.0 }
  0x8d   :  { %200 = vmatpush.msrb.mxu2 %v135_v20  ;;  %220 = vmatpush.msrb.mxu3 %v136_v21 }
  0x8e   :  { %458 = vmatmul.msk.f32.vlgmr.msrb.gmra.mxu2 %vm49_vm0, %v34_v15  ;;  %459 = vmatmul.msk.f32.vlgmr.msrb.gmra.mxu3 %vm49_vm0, %v34_v15 }
 0x104   :  { %v162_v25 = vpop.f32.mrf.mxu0  ;;  %v182_v26 = vpop.f32.mrf.mxu1 }
 0x105   :  { %v163_v27 = vadd.f32 %v162_v25, %v140_v24  ;;  %v183_v28 = vadd.f32 %v182_v26, %v140_v24 }
 0x107   :  { %v225_v29 = vmax.f32 %v163_v27, 0.0  ;;  %v226_v30 = vmax.f32 %v183_v28, 0.0 }
 0x109   :  { %252 = vmatpush.msra.mxu0 %v225_v29  ;;  %272 = vmatpush.msra.mxu1 %v226_v30 }
 0x10a   :  { %460 = vmatmul.msk.f32.vlgmr.msra.gmra.mxu0 %vm49_vm0, %v36_v31  ;;  %461 = vmatmul.msk.f32.vlgmr.msra.gmra.mxu1 %vm49_vm0, %v36_v31 }
 0x111   :  { %v202_v32 = vpop.f32.mrf.mxu2  ;;  %v222_v33 = vpop.f32.mrf.mxu3 }
 0x112   :  { %v203_v34 = vadd.f32 %v202_v32, %v140_v24  ;;  %v223_v35 = vadd.f32 %v222_v33, %v140_v24 }
 0x114   :  { %v227_v36 = vmax.f32 %v203_v34, 0.0  ;;  %v228_v37 = vmax.f32 %v223_v35, 0.0 }
 0x116   :  { %292 = vmatpush.msra.mxu2 %v227_v36  ;;  %312 = vmatpush.msra.mxu3 %v228_v37 }
 0x117   :  { %462 = vmatmul.msk.f32.vlgmr.msra.gmra.mxu2 %vm49_vm0, %v36_v31  ;;  %463 = vmatmul.msk.f32.vlgmr.msra.gmra.mxu3 %vm49_vm0, %v36_v31 }
 0x187   :  { %v254_v39 = vpop.f32.mrf.mxu0  ;;  %v274_v40 = vpop.f32.mrf.mxu1 }
 0x188   :  { %v255_v41 = vadd.f32 %v254_v39, %v232_v38  ;;  %v275_v42 = vadd.f32 %v274_v40, %v232_v38 }
 0x18a   :  { %v317_v43 = vmax.f32 %v255_v41, 0.0  ;;  %v318_v44 = vmax.f32 %v275_v42, 0.0 }
 0x18c   :  { %344 = vmatpush.msrb.mxu0 %v317_v43  ;;  %364 = vmatpush.msrb.mxu1 %v318_v44 }
 0x18d   :  { %464 = vmatmul.msk.f32.vlgmr.msrb.gmra.mxu0 %vm49_vm0, %v38_v45  ;;  %465 = vmatmul.msk.f32.vlgmr.msrb.gmra.mxu1 %vm49_vm0, %v38_v45 }
 0x19a   :  { %v294_v46 = vpop.f32.mrf.mxu2  ;;  %v314_v47 = vpop.f32.mrf.mxu3 }
 0x19b   :  { %v295_v48 = vadd.f32 %v294_v46, %v232_v38  ;;  %v315_v49 = vadd.f32 %v314_v47, %v232_v38 }
 0x19d   :  { %v319_v50 = vmax.f32 %v295_v48, 0.0  ;;  %v320_v51 = vmax.f32 %v315_v49, 0.0 }
 0x19f   :  { %384 = vmatpush.msrb.mxu2 %v319_v50  ;;  %404 = vmatpush.msrb.mxu3 %v320_v51 }
 0x1a0   :  { %466 = vmatmul.msk.f32.vlgmr.msrb.gmra.mxu2 %vm49_vm0, %v38_v45  ;;  %467 = vmatmul.msk.f32.vlgmr.msrb.gmra.mxu3 %vm49_vm0, %v38_v45 }
 0x20a   :  { %v366_v52 = vpop.f32.mrf.mxu1  ;;  %v346_v55 = vpop.f32.mrf.mxu0 }
 0x20b   :  { %v367_v54 = vadd.f32 %v366_v52, %v324_v53  ;;  %v347_v57 = vadd.f32 %v346_v55, %v324_v53 }
 0x20d   :  { %v410_v56 = vsub.f32 0.0, %v367_v54  ;;  %v409_v59 = vsub.f32 0.0, %v347_v57 }
 0x20f   :  { %v415_v58 = vmul.f32 1.442695, %v410_v56  ;;  %v413_v0 = vmul.f32 1.442695, %v409_v59 }
 0x211   :  { %471 = vpow2.f32 %v415_v58 }
 0x212   :  { %473 = vpow2.f32 %v413_v0 }
 0x217   :  { %v472_v5 = vpop.eup %471 }
 0x218   :  { %v422_v6 = vadd.f32 1.0, %v472_v5  ;;  %v474_v7 = vpop.eup %473 }
 0x219   :  { %v421_v11 = vadd.f32 1.0, %v474_v7 }
 0x223   :  { %v386_v60 = vpop.f32.mrf.mxu2  ;;  %v406_v61 = vpop.f32.mrf.mxu3 }
 0x224   :  { %v387_v62 = vadd.f32 %v386_v60, %v324_v53  ;;  %v407_v63 = vadd.f32 %v406_v61, %v324_v53 }
 0x226   :  { %v411_v1 = vsub.f32 0.0, %v387_v62  ;;  %v412_v2 = vsub.f32 0.0, %v407_v63 }
 0x228   :  { %v417_v3 = vmul.f32 1.442695, %v411_v1  ;;  %v419_v4 = vmul.f32 1.442695, %v412_v2 }
 0x22a   :  { %475 = vpow2.f32 %v417_v3 }
 0x22b   :  { %477 = vpow2.f32 %v419_v4 }
 0x22c   :  { %479 = vrcp.f32 %v422_v6 }
 0x230   :  { %v476_v8 = vpop.eup %475 }
 0x231   :  { %v478_v9 = vpop.eup %477  ;;  %v423_v10 = vadd.f32 1.0, %v476_v8 }
 0x232   :  { %v424_v12 = vadd.f32 1.0, %v478_v9  ;;  %v480_v13 = vpop.eup %479 }
 0x233   :  { %481 = vrcp.f32 %v423_v10  ;;  %v433_v16 = vrot.slane %v480_v13, 7 }
 0x234   :  { %483 = vrcp.f32 %v424_v12 }
 0x235   :  { %485 = vrcp.f32 %v421_v11 }
 0x239   :  { %v482_v15 = vpop.eup %481 }
 0x23a   :  { %v484_v17 = vpop.eup %483  ;;  %v434_v18 = vrot.slane %v482_v15, 6 }
 0x23b   :  { %v435_v19 = vrot.slane %v484_v17, 5  ;;  %v486_v20 = vpop.eup %485 }
 0x23c   :  { %v437_v21 = vsel %vm436_vm1, %v486_v20, %v433_v16 }
 0x23d   :  { %v439_v22 = vsel %vm438_vm2, %v434_v18, %v435_v19 }
 0x23e   :  { %v441_v23 = vsel %vm440_vm3, %v437_v21, %v439_v22 }
 0x23f   :  { %447 = vst.msk [vmem:[%s602_s9] sm:$0xf] %vm445_vm4, %v441_v23 }

</bundles_post_ra>
